<compile_context>
chip_gen: v7x
topology: tpu7x:2x2x1
jax: 0.10.0
libtpu: 0.0.40
codegen_flags: <defaults>
</compile_context>

<pallas_src>
import jax
import jax.numpy as jnp
from jax.experimental import pallas as pl
from jax.experimental.pallas import tpu as pltpu


def _pixelnorm_kernel(x_ref, o_ref):
    # x_ref / o_ref: (Nb, C, T_HW) block; each HW column is independent.
    x = x_ref[...]                                   # native dtype (f32 or bf16)
    xf = x.astype(jnp.float32)                       # reduction math in f32
    mean_sq = jnp.mean(xf * xf, axis=1, keepdims=True)   # (Nb, 1, T_HW), XLU sublane reduce
    inv = jax.lax.rsqrt(mean_sq + 1e-8)                  # EUP; broadcast over C
    # Final scale stays in the input dtype: keeps bf16 tiles bf16 (halves vreg/
    # VMEM pressure); for f32 inputs the casts are no-ops.
    o_ref[...] = x * inv.astype(x.dtype)


def _choose_tiles(N, C, HW, itemsize, block_budget_bytes=2 << 20):
    """Pick (Nb, T_HW) so one block is ~<= 2 MiB -> <= ~8 MiB pipelined (2 in + 2 out)."""
    # Lane tile: multiple of 128 (unmasked full-lane stores) unless HW < 128,
    # in which case the only legal choice is the full dim.
    if HW < 128:
        t_hw = HW
    else:
        max_lanes = max(128, (block_budget_bytes // (C * itemsize)) // 128 * 128)
        hw_128 = HW if HW % 128 == 0 else (HW // 128) * 128
        t_hw = min(hw_128, max_lanes)
    # Batch rows per step: grow the block toward the budget when C*T_HW is tiny.
    row_bytes = C * t_hw * itemsize
    nb = max(1, min(N, block_budget_bytes // max(row_bytes, 1)))
    return nb, t_hw


def pixel_norm(x):
    """x: (N, C, H, W) -> same shape/dtype, normalized over the channel dim."""
    N, C, H, W = x.shape
    HW = H * W
    itemsize = jnp.dtype(x.dtype).itemsize
    x2 = x.reshape(N, C, HW)

    nb, t_hw = _choose_tiles(N, C, HW, itemsize)
    grid = (pl.cdiv(N, nb), pl.cdiv(HW, t_hw))

    # Advisory cost hint: purely memory-bound (read + write the tensor once).
    cost = pl.CostEstimate(
        flops=3 * N * C * HW,            # square, reduce-add, scale
        transcendentals=N * HW,          # one rsqrt per pixel
        bytes_accessed=2 * N * C * HW * itemsize,
    )

    out = pl.pallas_call(
        _pixelnorm_kernel,
        out_shape=jax.ShapeDtypeStruct((N, C, HW), x.dtype),
        grid_spec=pltpu.PrefetchScalarGridSpec(
            num_scalar_prefetch=0,
            grid=grid,
            in_specs=[pl.BlockSpec((nb, C, t_hw), lambda n, h: (n, 0, h))],
            out_specs=pl.BlockSpec((nb, C, t_hw), lambda n, h: (n, 0, h)),
        ),
        compiler_params=pltpu.CompilerParams(
            dimension_semantics=("parallel", "parallel"),
        ),
        cost_estimate=cost,
    )(x2)

    return out.reshape(N, C, H, W)


if __name__ == "__main__":
    key = jax.random.PRNGKey(0)
    x = jax.random.normal(key, (2, 4, 16, 16), dtype=jnp.float32)

    y = pixel_norm(x)
    jax.block_until_ready(y)

    # reference check (pure JAX, mirrors the PyTorch forward)
    ref = x / jnp.sqrt(jnp.mean(x ** 2, axis=1, keepdims=True) + 1e-8)
    assert y.shape == x.shape and y.dtype == x.dtype
    assert jnp.allclose(y, ref, atol=1e-5, rtol=1e-5)

    print("KERNEL_OK")
</pallas_src>

<mosaic_0001>
module attributes {stable_mosaic.version = 11 : i64} {
  func.func @_pixelnorm_kernel(%arg0: i32, %arg1: i32, %arg2: memref<2x4x256xf32, #tpu.memory_space<vmem>>, %arg3: memref<2x4x256xf32, #tpu.memory_space<vmem>>) attributes {dimension_semantics = [#tpu.dimension_semantics<parallel>, #tpu.dimension_semantics<parallel>], iteration_bounds = array<i64: 1, 1>, scalar_prefetch = 0 : i64, scratch_operands = 0 : i64, tpu.core_type = #tpu.core_type<tc>, window_params = [{transform_indices = @transform_0, window_bounds = array<i64: 2, 4, 256>}, {transform_indices = @transform_1, window_bounds = array<i64: 2, 4, 256>}]} {
    %c0 = arith.constant 0 : index
    %c0_0 = arith.constant 0 : index
    %c0_1 = arith.constant 0 : index
    %0 = vector.load %arg2[%c0, %c0_0, %c0_1] : memref<2x4x256xf32, #tpu.memory_space<vmem>>, vector<2x4x256xf32>
    %1 = arith.mulf %0, %0 : vector<2x4x256xf32>
    %cst = arith.constant dense<0.000000e+00> : vector<2x256xf32>
    %2 = vector.multi_reduction <add>, %1, %cst [1] : vector<2x4x256xf32> to vector<2x256xf32>
    %3 = vector.shape_cast %2 : vector<2x256xf32> to vector<2x1x256xf32>
    %cst_2 = arith.constant 4.000000e+00 : f32
    %4 = vector.broadcast %cst_2 : f32 to vector<2x1x256xf32>
    %5 = arith.divf %3, %4 : vector<2x1x256xf32>
    %cst_3 = arith.constant 9.99999993E-9 : f32
    %6 = vector.broadcast %cst_3 : f32 to vector<2x1x256xf32>
    %7 = arith.addf %5, %6 : vector<2x1x256xf32>
    %8 = math.rsqrt %7 : vector<2x1x256xf32>
    %9 = vector.broadcast %8 : vector<2x1x256xf32> to vector<2x4x256xf32>
    %10 = arith.mulf %0, %9 : vector<2x4x256xf32>
    %c0_4 = arith.constant 0 : index
    %c0_5 = arith.constant 0 : index
    %c0_6 = arith.constant 0 : index
    %11 = vector.load %arg3[%c0_4, %c0_5, %c0_6] : memref<2x4x256xf32, #tpu.memory_space<vmem>>, vector<2x4x256xf32>
    tpu.vector_store %arg3[%c0_4, %c0_5, %c0_6], %10 {strides = array<i32>} : memref<2x4x256xf32, #tpu.memory_space<vmem>>, vector<2x4x256xf32>,
    return
  }
  func.func @transform_0(%arg0: i32, %arg1: i32) -> (i32, i32, i32) {
    %c0_i32 = arith.constant 0 : i32
    %c0_i32_0 = arith.constant 0 : i32
    return %arg0, %c0_i32, %arg1 : i32, i32, i32
  }
  func.func @transform_1(%arg0: i32, %arg1: i32) -> (i32, i32, i32) {
    %c0_i32 = arith.constant 0 : i32
    %c0_i32_0 = arith.constant 0 : i32
    return %arg0, %c0_i32, %arg1 : i32, i32, i32
  }
}

</mosaic_0001>

<bundles_post_ra>
// kernel: tpu_custom_call.1
= control target key start
LH: loop header
LB: loop body
LE: loop exit
PB: predicated region body
PF: predicated region fallthrough
CT: control target
= control target key end

     0   :  { %6 = vsyncpa [#allocation3], 0  ;;  %s208_s0 = inlined_call_operand.hbm [shape: f32[2,4,256], index: 0, kind: input, shape index: {}]   ;;  %s209_s1 = inlined_call_operand.hbm [shape: f32[2,4,256], index: 1, kind: output, shape index: {}]  }
   0x1   :  { %7 = vsyncpa [#allocation4], 0  ;;  %s164_s6 = smov [#allocation2]   ;;  %s116_s10 = scalar_lea.hbm %s208_s0, 256 }
   0x2   :  { %s13_s7 = sshll.u32 %s164_s6, 4  ;;  %p117_p0 = scmp.ne.s32.totalorder %s208_s0, %s116_s10  ;;  %s14_s7 = int_to_ptr.vmem [resolvable:$true] %s13_s7 }
   0x3   :  { %p120_p1 = scmp.lt.u32.totalorder %s116_s10, %s208_s0 }
   0x5   :  { %p122_p2 = pnand %p120_p1, %p117_p0 }
   0x7   :  { %125 = shalt.err (!%p122_p2)
}
   0x8   :  { %s126_s15 = scalar_lea.vmem %s14_s7, 256  ;;  %p131_p4 = scmp.lt.s32.totalorder %s14_s7, %s14_s7 }
   0x9   :  { %p127_p3 = scmp.ne.s32.totalorder %s14_s7, %s126_s15  ;;  %p132_p5 = scmp.lt.s32.totalorder %s126_s15, %s126_s15 }
   0xb   :  { %p133_p6 = por %p132_p5, %p131_p4 }
   0xd   :  { %p134_p7 = pnand %p133_p6, %p127_p3 }
   0xf   :  { %137 = shalt.err (!%p134_p7)
}
  0x10   :  { %s165_s16 = smov 128   ;;  %s166_s17 = smov 8  }
  0x11   :  { %19 = dma.hbm_to_vmem [thread:$0]  %s208_s0, 256, %s14_s7, [#allocation3], %s165_s16, %s165_s16, %s166_s17  }
  0x12   :  { %160 = dma.done.wait [#allocation3], 256  }
  0x13   :  { %161 = vsyncadd [#allocation3], 4294967040  ;;  %v23_v0 = vld [vmem:[#allocation2] sm:$0xff]  ;;  %vm33_vm0 = vcmask 1043456   ;;  %v24_v1 = vld [vmem:[#allocation2 + $0x8] sm:$0xff]  ;;  %s167_s0 = smov [#allocation5]  }
  0x14   :  { %v25_v2 = vmul.f32 %v23_v0, %v23_v0  ;;  %v26_v3 = vmul.f32 %v24_v1, %v24_v1  ;;  %s92_s20 = sshll.u32 %s167_s0, 4  ;;  %s93_s20 = int_to_ptr.vmem [resolvable:$true] %s92_s20 }
  0x15   :  { %s138_s21 = scalar_lea.vmem %s93_s20, 256  ;;  %p143_p9 = scmp.lt.s32.totalorder %s93_s20, %s93_s20 }
  0x16   :  { %v29_v4 = vcombine.high %v25_v2, %v25_v2  ;;  %v34_v5 = vsel %vm33_vm0, %v25_v2, 0.0  ;;  %v30_v6 = vcombine.high %v26_v3, %v26_v3  ;;  %v48_v7 = vsel %vm33_vm0, %v26_v3, 0.0  ;;  %p139_p8 = scmp.ne.s32.totalorder %s93_s20, %s138_s21  ;;  %p144_p10 = scmp.lt.s32.totalorder %s138_s21, %s138_s21 }
  0x17   :  { %v35_v8 = vrot.slane %v34_v5, 4  ;;  %v49_v9 = vrot.slane %v48_v7, 4 }
  0x18   :  { %v41_v10 = vsel %vm33_vm0, %v29_v4, 0.0  ;;  %v55_v11 = vsel %vm33_vm0, %v30_v6, 0.0  ;;  %p145_p11 = por %p144_p10, %p143_p9 }
  0x19   :  { %v36_v12 = vadd.f32 %v35_v8, %v34_v5  ;;  %v42_v13 = vrot.slane %v41_v10, 4  ;;  %v50_v14 = vadd.f32 %v49_v9, %v48_v7  ;;  %v56_v15 = vrot.slane %v55_v11, 4 }
  0x1a   :  { %p146_p12 = pnand %p145_p11, %p139_p8 }
  0x1b   :  { %v37_v16 = vrot.slane %v36_v12, 2  ;;  %v43_v17 = vadd.f32 %v42_v13, %v41_v10  ;;  %v51_v18 = vrot.slane %v50_v14, 2  ;;  %v57_v19 = vadd.f32 %v56_v15, %v55_v11 }
  0x1d   :  { %v38_v20 = vadd.f32 %v37_v16, %v36_v12  ;;  %v44_v21 = vrot.slane %v43_v17, 2  ;;  %v52_v22 = vadd.f32 %v51_v18, %v50_v14  ;;  %v58_v23 = vrot.slane %v57_v19, 2 }
  0x1f   :  { %v39_v24 = vrot.slane %v38_v20, 1  ;;  %v45_v25 = vadd.f32 %v44_v21, %v43_v17  ;;  %v53_v26 = vrot.slane %v52_v22, 1  ;;  %v59_v27 = vadd.f32 %v58_v23, %v57_v19 }
  0x21   :  { %v40_v28 = vadd.f32 %v39_v24, %v38_v20  ;;  %v46_v29 = vrot.slane %v45_v25, 1  ;;  %v54_v30 = vadd.f32 %v53_v26, %v52_v22  ;;  %v60_v31 = vrot.slane %v59_v27, 1 }
  0x23   :  { %v47_v32 = vadd.f32 %v46_v29, %v45_v25  ;;  %v63_v33 = vmul.f32 0.25, %v40_v28  ;;  %v61_v34 = vadd.f32 %v60_v31, %v59_v27  ;;  %v65_v35 = vmul.f32 0.25, %v54_v30 }
  0x25   :  { %v64_v36 = vmul.f32 0.25, %v47_v32  ;;  %v67_v37 = vadd.f32 1e-08, %v63_v33  ;;  %v66_v38 = vmul.f32 0.25, %v61_v34  ;;  %v69_v39 = vadd.f32 1e-08, %v65_v35 }
  0x27   :  { %v68_v40 = vadd.f32 1e-08, %v64_v36  ;;  %108 = vrsqrt.f32 %v67_v37  ;;  %v70_v41 = vadd.f32 1e-08, %v66_v38 }
  0x28   :  { %110 = vrsqrt.f32 %v69_v39 }
  0x29   :  { %112 = vrsqrt.f32 %v68_v40 }
  0x2a   :  { %114 = vrsqrt.f32 %v70_v41 }
  0x31   :  { %v109_v42 = vpop.eup %108 }
  0x32   :  { %v111_v43 = vpop.eup %110 }
  0x33   :  { %v113_v44 = vpop.eup %112 }
  0x34   :  { %v115_v45 = vpop.eup %114  ;;  %v79_v46 = vcombine.low %v109_v42, %v113_v44 }
  0x35   :  { %v80_v47 = vcombine.low %v111_v43, %v115_v45 }
  0x36   :  { %v83_v48 = vmul.f32 %v79_v46, %v23_v0 }
  0x37   :  { %v84_v49 = vmul.f32 %v80_v47, %v24_v1 }
  0x38   :  { %85 = vst [vmem:[#allocation5] sm:$0xff] %v83_v48 }
  0x39   :  { %86 = vst [vmem:[#allocation5 + $0x8] sm:$0xff] %v84_v49 }
  0x3a   :  { %149 = shalt.err (!%p146_p12)
}
  0x3b   :  { %s150_s24 = scalar_lea.hbm %s209_s1, 256 }
  0x3c   :  { %p151_p13 = scmp.ne.s32.totalorder %s209_s1, %s150_s24  ;;  %p154_p0 = scmp.lt.u32.totalorder %s150_s24, %s209_s1 }
  0x3e   :  { %p156_p1 = pnand %p154_p0, %p151_p13 }
  0x40   :  { %159 = shalt.err (!%p156_p1)
}
  0x41   :  { %98 = dma.vmem_to_hbm [thread:$0]  %s93_s20, 256, %s209_s1, [#allocation4], %s165_s16, %s165_s16, %s166_s17  }
  0x42   :  { %162 = dma.done.wait [#allocation4], 256  }
  0x43   :  { %163 = vsyncadd [#allocation4], 4294967040 }
  0x44   :  { %102 = vsyncpa [#allocation3], 1 }
  0x45   :  { %103 = vsyncpa [#allocation4], 1 }

</bundles_post_ra>
